<compile_context>
chip_gen: v5e
topology: v5e:2x2
jax: 0.10.0
libtpu: 0.0.40
codegen_flags: <defaults>
</compile_context>

<pallas_src>
import functools

import jax
import jax.numpy as jnp
from jax.experimental import pallas as pl
from jax.experimental.pallas import tpu as pltpu

SEM_DIM, JIG_DIM, EMB_DIM = 300, 31, 128


def _round_up(x, m):
    return (x + m - 1) // m * m


# --------------------------------------------------------------------------
# Pallas matmul kernel with fused (scale, bias, activation) epilogue.
# bf16 operands on the MXU, f32 accumulator, used for every conv / FC / head.
# --------------------------------------------------------------------------
def _mm_kernel(a_ref, b_ref, s_ref, c_ref, o_ref, acc_ref, *, act):
    @pl.when(pl.program_id(2) == 0)
    def _():
        acc_ref[...] = jnp.zeros_like(acc_ref)

    acc_ref[...] += jnp.dot(a_ref[...], b_ref[...],
                            preferred_element_type=jnp.float32)

    @pl.when(pl.program_id(2) == pl.num_programs(2) - 1)
    def _():
        s = s_ref[...][:1]          # (1, tn) — rows are replicated
        c = c_ref[...][:1]
        y = acc_ref[...] * s + c
        if act == "relu":
            y = jnp.maximum(y, 0.0)
        elif act == "sigmoid":
            y = jax.nn.sigmoid(y)
        o_ref[...] = y.astype(o_ref.dtype)


@functools.lru_cache(maxsize=None)
def _matmul_call(Mp, Kp, Np, tm, tn, tk, act, out_dtype_name):
    grid = (Mp // tm, Np // tn, Kp // tk)
    return pl.pallas_call(
        functools.partial(_mm_kernel, act=act),
        out_shape=jax.ShapeDtypeStruct((Mp, Np), jnp.dtype(out_dtype_name)),
        grid_spec=pltpu.PrefetchScalarGridSpec(
            num_scalar_prefetch=0,
            grid=grid,
            in_specs=[
                pl.BlockSpec((tm, tk), lambda i, j, k: (i, k)),
                pl.BlockSpec((tk, tn), lambda i, j, k: (k, j)),
                pl.BlockSpec((8, tn), lambda i, j, k: (0, j)),
                pl.BlockSpec((8, tn), lambda i, j, k: (0, j)),
            ],
            out_specs=pl.BlockSpec((tm, tn), lambda i, j, k: (i, j)),
            scratch_shapes=[pltpu.VMEM((tm, tn), jnp.float32)],
        ),
        compiler_params=pltpu.CompilerParams(
            dimension_semantics=("parallel", "parallel", "arbitrary")),
    )


def pallas_matmul(a, b, scale=None, bias=None, act=None, out_dtype=jnp.float32):
    """(M,K)@(K,N) * scale[N] + bias[N] (+ optional relu/sigmoid).

    Operands are cast to bf16 (MXU-native on v5e/v6e/v7x); accumulation is f32.
    """
    M, K = a.shape
    K2, N = b.shape
    assert K == K2
    if scale is None:
        scale = jnp.ones((N,), jnp.float32)
    if bias is None:
        bias = jnp.zeros((N,), jnp.float32)

    a = a.astype(jnp.bfloat16)
    b = b.astype(jnp.bfloat16)

    # Tile selection: 256x256 output tiles to match the 2x256^2 MXU when the
    # problem is big enough; bf16 sublane packing needs tm % 16 == 0.
    if M >= 256:
        tm = 256
    elif M >= 128:
        tm = 128
    else:
        tm = _round_up(M, 16)
    tn = 256 if N >= 256 else 128
    k128 = _round_up(K, 128)
    if k128 <= 1024:
        tk = k128
    else:
        tk = 512
        for cand in (512, 576, 640, 768, 896, 1024):
            if k128 % cand == 0:
                tk = cand
                break
    Mp, Kp, Np = _round_up(M, tm), _round_up(K, tk), _round_up(N, tn)

    if (Mp, Kp) != (M, K):
        a = jnp.pad(a, ((0, Mp - M), (0, Kp - K)))
    if (Kp, Np) != (K, N):
        b = jnp.pad(b, ((0, Kp - K), (0, Np - N)))
    s = scale.astype(jnp.float32)
    c = bias.astype(jnp.float32)
    if Np != N:
        s = jnp.pad(s, (0, Np - N))
        c = jnp.pad(c, (0, Np - N))
    s = jnp.broadcast_to(s.reshape(1, Np), (8, Np))
    c = jnp.broadcast_to(c.reshape(1, Np), (8, Np))

    out = _matmul_call(Mp, Kp, Np, tm, tn, tk, act,
                       jnp.dtype(out_dtype).name)(a, b, s, c)
    if (Mp, Np) != (M, N):
        out = out[:M, :N]
    return out


# --------------------------------------------------------------------------
# Global average pooling kernel: (N, HW, C) -> (N, C), HW-tiled reduction.
# --------------------------------------------------------------------------
def _gap_kernel(x_ref, o_ref, *, inv_hw):
    @pl.when(pl.program_id(0) == 0)
    def _():
        o_ref[...] = jnp.zeros_like(o_ref)

    o_ref[...] += jnp.sum(x_ref[...].astype(jnp.float32), axis=1)

    @pl.when(pl.program_id(0) == pl.num_programs(0) - 1)
    def _():
        o_ref[...] = o_ref[...] * inv_hw


@functools.lru_cache(maxsize=None)
def _gap_call(N, HWp, C, hw_tile, hw_true):
    grid = (HWp // hw_tile,)
    return pl.pallas_call(
        functools.partial(_gap_kernel, inv_hw=1.0 / float(hw_true)),
        out_shape=jax.ShapeDtypeStruct((N, C), jnp.float32),
        grid_spec=pltpu.PrefetchScalarGridSpec(
            num_scalar_prefetch=0,
            grid=grid,
            in_specs=[pl.BlockSpec((N, hw_tile, C), lambda k: (0, k, 0))],
            out_specs=pl.BlockSpec((N, C), lambda k: (0, 0)),
        ),
        compiler_params=pltpu.CompilerParams(
            dimension_semantics=("arbitrary",)),
    )


def pallas_global_avg_pool(x):
    """x: (N, HW, C) -> (N, C) float32 mean over HW (tiled along HW)."""
    N, HW, C = x.shape
    row_bytes = N * C * 4
    cap = max(8, min(512, (4 * 1024 * 1024 // max(row_bytes, 1)) // 8 * 8))
    if HW <= cap:
        hw_tile, HWp = HW, HW
    else:
        hw_tile = cap
        HWp = _round_up(HW, hw_tile)
        x = jnp.pad(x, ((0, 0), (0, HWp - HW), (0, 0)))
    return _gap_call(N, HWp, C, hw_tile, HW)(x)


# --------------------------------------------------------------------------
# SE scale * features + residual, then ReLU (fused elementwise, HW-tiled).
# --------------------------------------------------------------------------
def _se_scale_add_relu_kernel(x_ref, s_ref, r_ref, o_ref):
    x = x_ref[...].astype(jnp.float32)
    r = r_ref[...].astype(jnp.float32)
    s = s_ref[...].astype(jnp.float32)
    o_ref[...] = jnp.maximum(x * s[:, None, :] + r, 0.0).astype(o_ref.dtype)


@functools.lru_cache(maxsize=None)
def _se_scale_add_relu_call(N, HWp, C, hw_tile, dtype_name):
    grid = (HWp // hw_tile,)
    return pl.pallas_call(
        _se_scale_add_relu_kernel,
        out_shape=jax.ShapeDtypeStruct((N, HWp, C), jnp.dtype(dtype_name)),
        grid_spec=pltpu.PrefetchScalarGridSpec(
            num_scalar_prefetch=0,
            grid=grid,
            in_specs=[
                pl.BlockSpec((N, hw_tile, C), lambda k: (0, k, 0)),
                pl.BlockSpec((N, C), lambda k: (0, 0)),
                pl.BlockSpec((N, hw_tile, C), lambda k: (0, k, 0)),
            ],
            out_specs=pl.BlockSpec((N, hw_tile, C), lambda k: (0, k, 0)),
        ),
        compiler_params=pltpu.CompilerParams(
            dimension_semantics=("parallel",)),
    )


def pallas_se_scale_add_relu(x, s, r):
    N, HW, C = x.shape
    row_bytes = N * C * 4
    cap = max(8, min(512, (2 * 1024 * 1024 // max(row_bytes, 1)) // 8 * 8))
    if HW <= cap:
        hw_tile, HWp = HW, HW
    else:
        hw_tile = cap
        HWp = _round_up(HW, hw_tile)
        x = jnp.pad(x, ((0, 0), (0, HWp - HW), (0, 0)))
        r = jnp.pad(r, ((0, 0), (0, HWp - HW), (0, 0)))
    out = _se_scale_add_relu_call(N, HWp, C, hw_tile,
                                  jnp.dtype(x.dtype).name)(x, s, r)
    if HWp != HW:
        out = out[:, :HW, :]
    return out


# --------------------------------------------------------------------------
# L2 normalization kernel (Normalize(power=2)) with epsilon guard.
# --------------------------------------------------------------------------
def _l2norm_kernel(x_ref, o_ref):
    x = x_ref[...]
    norm = jnp.sqrt(jnp.sum(x * x, axis=1, keepdims=True))
    o_ref[...] = x / jnp.maximum(norm, 1e-12)


@functools.lru_cache(maxsize=None)
def _l2norm_call(N, C):
    return pl.pallas_call(
        _l2norm_kernel,
        out_shape=jax.ShapeDtypeStruct((N, C), jnp.float32))


def pallas_l2norm(x):
    N, C = x.shape
    return _l2norm_call(N, C)(x.astype(jnp.float32))


# --------------------------------------------------------------------------
# Plain-JAX glue (runs fused inside the single outer jax.jit)
# --------------------------------------------------------------------------
def im2col(x, kh, kw, stride, pad):
    """x: (N,H,W,C) -> patches (N*Ho*Wo, kh*kw*C), matching PyTorch conv math."""
    N, H, W, C = x.shape
    if pad:
        x = jnp.pad(x, ((0, 0), (pad, pad), (pad, pad), (0, 0)))
    Hp, Wp = H + 2 * pad, W + 2 * pad
    Ho = (Hp - kh) // stride + 1
    Wo = (Wp - kw) // stride + 1
    cols = []
    for di in range(kh):
        for dj in range(kw):
            cols.append(x[:, di:di + stride * (Ho - 1) + 1:stride,
                           dj:dj + stride * (Wo - 1) + 1:stride, :])
    patches = jnp.stack(cols, axis=3)                # (N, Ho, Wo, kh*kw, C)
    return patches.reshape(N * Ho * Wo, kh * kw * C), Ho, Wo


# TODO(synk): MaxPool2d(3, stride=2, ceil_mode=True) is strided-slice + max glue
# rather than a dedicated Pallas kernel.
def max_pool_3x3_s2_ceil(x):
    N, H, W, C = x.shape
    Ho = -(-(H - 3) // 2) + 1
    Wo = -(-(W - 3) // 2) + 1
    pad_h = max(0, (Ho - 1) * 2 + 3 - H)
    pad_w = max(0, (Wo - 1) * 2 + 3 - W)
    neg = float(jnp.finfo(x.dtype).min)
    xp = jnp.pad(x, ((0, 0), (0, pad_h), (0, pad_w), (0, 0)),
                 constant_values=neg)
    out = None
    for di in range(3):
        for dj in range(3):
            tap = xp[:, di:di + 2 * (Ho - 1) + 1:2,
                     dj:dj + 2 * (Wo - 1) + 1:2, :]
            out = tap if out is None else jnp.maximum(out, tap)
    return out


def conv_bn_act(x, p, stride, pad, act):
    """conv (no bias) + folded eval-mode BN + optional ReLU via Pallas matmul."""
    w = p['w']                                     # (kh, kw, Cin, Cout) bf16
    kh, kw, cin, cout = w.shape
    N = x.shape[0]
    if kh == 1 and kw == 1 and pad == 0:
        if stride > 1:
            x = x[:, ::stride, ::stride, :]        # 1x1 conv: no im2col at all
        Ho, Wo = x.shape[1], x.shape[2]
        patches = x.reshape(N * Ho * Wo, cin)
    else:
        # TODO(synk): 3x3 / 7x7 convs still materialize im2col patches in HBM;
        # a halo-aware direct-conv Pallas kernel would remove the 9x traffic.
        patches, Ho, Wo = im2col(x, kh, kw, stride, pad)
    out = pallas_matmul(patches, w.reshape(kh * kw * cin, cout),
                        p['scale'], p['bias'], act, out_dtype=jnp.bfloat16)
    return out.reshape(N, Ho, Wo, cout)


# --------------------------------------------------------------------------
# Parameter initialization (deterministic, synthetic; BN folded at init).
# --------------------------------------------------------------------------
def _init_params(key):
    keys = iter(jax.random.split(key, 512))
    nk = lambda: next(keys)

    def init_conv(kh, kw, cin, cout):
        fan_in = kh * kw * cin
        return (jax.random.normal(nk(), (kh, kw, cin, cout), jnp.float32)
                * (2.0 / fan_in) ** 0.5)

    def conv_bn(cin, cout, k):
        w = init_conv(k, k, cin, cout)
        k1, k2, k3, k4 = jax.random.split(nk(), 4)
        gamma = 1.0 + 0.1 * jax.random.normal(k1, (cout,), jnp.float32)
        beta = 0.1 * jax.random.normal(k2, (cout,), jnp.float32)
        mean = 0.1 * jax.random.normal(k3, (cout,), jnp.float32)
        var = jnp.abs(jax.random.normal(k4, (cout,), jnp.float32)) * 0.1 + 1.0
        scale = gamma / jnp.sqrt(var + 1e-5)        # eval-mode BN fold (once)
        bias = beta - mean * scale
        return dict(w=w.astype(jnp.bfloat16), scale=scale, bias=bias)

    def linear(cin, cout):
        return dict(w=jax.random.normal(nk(), (cin, cout), jnp.float32)
                      * (1.0 / cin) ** 0.5,
                    b=0.1 * jax.random.normal(nk(), (cout,), jnp.float32))

    params = {'layer0': conv_bn(3, 64, 7)}

    def make_block(inplanes, planes, has_ds):
        c4, cr = planes * 4, (planes * 4) // 16
        blk = dict(
            conv1=conv_bn(inplanes, planes, 1),
            conv2=conv_bn(planes, planes, 3),
            conv3=conv_bn(planes, c4, 1),
            se_fc1=dict(w=init_conv(1, 1, c4, cr).reshape(c4, cr).astype(jnp.bfloat16),
                        b=0.1 * jax.random.normal(nk(), (cr,), jnp.float32)),
            se_fc2=dict(w=init_conv(1, 1, cr, c4).reshape(cr, c4).astype(jnp.bfloat16),
                        b=0.1 * jax.random.normal(nk(), (c4,), jnp.float32)),
        )
        if has_ds:
            blk['downsample'] = conv_bn(inplanes, c4, 1)
        return blk

    cfg = ((64, 3, 1), (128, 4, 2), (256, 6, 2), (512, 3, 2))   # se_resnet50
    layers = []
    inplanes = 64
    for planes, nblocks, stride in cfg:
        blocks = []
        for bi in range(nblocks):
            has_ds = (bi == 0) and (stride != 1 or inplanes != planes * 4)
            blocks.append(make_block(inplanes, planes, has_ds))
            inplanes = planes * 4
        layers.append(blocks)
    params['layers'] = layers

    feat_dim = inplanes                                          # 2048
    last = linear(feat_dim, SEM_DIM)
    jig = linear(feat_dim, JIG_DIM)
    emb = linear(feat_dim, EMB_DIM)
    # Fuse the three heads into one lane-dense matmul (N = 300+31+128 = 459).
    params['heads'] = dict(
        w=jnp.concatenate([last['w'], jig['w'], emb['w']], axis=1),
        b=jnp.concatenate([last['b'], jig['b'], emb['b']]))
    return params, cfg


# --------------------------------------------------------------------------
# Forward pass (single outer jax.jit; cfg is static)
# --------------------------------------------------------------------------
def _block_forward(x, blk, stride):
    out = conv_bn_act(x, blk['conv1'], stride=stride, pad=0, act='relu')
    out = conv_bn_act(out, blk['conv2'], stride=1, pad=1, act='relu')
    out = conv_bn_act(out, blk['conv3'], stride=1, pad=0, act=None)
    if 'downsample' in blk:
        residual = conv_bn_act(x, blk['downsample'], stride=stride, pad=0, act=None)
    else:
        residual = x
    N, H, W, C = out.shape
    out3 = out.reshape(N, H * W, C)
    pooled = pallas_global_avg_pool(out3)                                   # (N, C) f32
    s = pallas_matmul(pooled, blk['se_fc1']['w'], bias=blk['se_fc1']['b'], act='relu')
    s = pallas_matmul(s, blk['se_fc2']['w'], bias=blk['se_fc2']['b'], act='sigmoid')
    y = pallas_se_scale_add_relu(out3, s, residual.reshape(N, H * W, C))
    return y.reshape(N, H, W, C)


@functools.partial(jax.jit, static_argnums=(2,))
def eisnet_seresnet50_forward(x_nchw, params, cfg):
    x = jnp.transpose(x_nchw, (0, 2, 3, 1)).astype(jnp.bfloat16)  # NCHW->NHWC bf16
    # layer0: conv7x7/s2 + BN + ReLU + MaxPool3x3/s2(ceil)
    x = conv_bn_act(x, params['layer0'], stride=2, pad=3, act='relu')
    x = max_pool_3x3_s2_ceil(x)
    # layer1..layer4
    for (planes, nblocks, stride), blocks in zip(cfg, params['layers']):
        for bi, blk in enumerate(blocks):
            x = _block_forward(x, blk, stride if bi == 0 else 1)
    N, H, W, C = x.shape
    # avg_pool (== global average pool at canonical resolution); dropout is None.
    feat = pallas_global_avg_pool(x.reshape(N, H * W, C))          # (N, 2048) f32
    heads = pallas_matmul(feat, params['heads']['w'], bias=params['heads']['b'])
    sem = heads[:, :SEM_DIM]
    jig = heads[:, SEM_DIM:SEM_DIM + JIG_DIM]
    emb = pallas_l2norm(heads[:, SEM_DIM + JIG_DIM:SEM_DIM + JIG_DIM + EMB_DIM])
    return sem, jig, emb


# --------------------------------------------------------------------------
if __name__ == "__main__":
    key = jax.random.PRNGKey(0)
    pkey, xkey = jax.random.split(key)
    params, cfg = _init_params(pkey)

    # Small demo input (PyTorch NCHW convention). Canonical is (B, 3, 224, 224);
    # 64x64 keeps the demo fast while exercising every stage.
    x = jax.random.normal(xkey, (2, 3, 64, 64), jnp.float32)

    # Quick correctness sanity for the Pallas matmul kernel (bf16 MXU, f32 acc).
    a = jax.random.normal(jax.random.PRNGKey(1), (64, 96), jnp.float32)
    b = jax.random.normal(jax.random.PRNGKey(2), (96, 48), jnp.float32)
    ref = jnp.dot(a.astype(jnp.bfloat16), b.astype(jnp.bfloat16),
                  preferred_element_type=jnp.float32)
    got = pallas_matmul(a, b)
    assert float(jnp.max(jnp.abs(got - ref))) < 1e-2

    sem, jig, emb = eisnet_seresnet50_forward(x, params, cfg)
    jax.block_until_ready((sem, jig, emb))

    assert sem.shape == (2, SEM_DIM) and jig.shape == (2, JIG_DIM) and emb.shape == (2, EMB_DIM)
    assert bool(jnp.all(jnp.isfinite(sem)))
    assert bool(jnp.all(jnp.isfinite(jig)))
    assert bool(jnp.all(jnp.isfinite(emb)))
    norms = jnp.sqrt(jnp.sum(emb * emb, axis=1))
    assert bool(jnp.all(jnp.abs(norms - 1.0) < 1e-3))   # l2norm head is unit-norm
    print("KERNEL_OK")
</pallas_src>

<mosaic_0001>
module attributes {stable_mosaic.version = 11 : i64} {
  func.func @_mm_kernel(%arg0: i32, %arg1: i32, %arg2: i32, %arg3: memref<64x128xbf16, #tpu.memory_space<vmem>>, %arg4: memref<128x128xbf16, #tpu.memory_space<vmem>>, %arg5: memref<8x128xf32, #tpu.memory_space<vmem>>, %arg6: memref<8x128xf32, #tpu.memory_space<vmem>>, %arg7: memref<64x128xf32, #tpu.memory_space<vmem>>, %arg8: memref<64x128xf32, #tpu.memory_space<vmem>>) attributes {dimension_semantics = [#tpu.dimension_semantics<parallel>, #tpu.dimension_semantics<parallel>, #tpu.dimension_semantics<arbitrary>], iteration_bounds = array<i64: 1, 1, 1>, scalar_prefetch = 0 : i64, scratch_operands = 1 : i64, tpu.core_type = #tpu.core_type<tc>, window_params = [{transform_indices = @transform_0, window_bounds = array<i64: 64, 128>}, {transform_indices = @transform_1, window_bounds = array<i64: 128, 128>}, {transform_indices = @transform_2, window_bounds = array<i64: 8, 128>}, {transform_indices = @transform_3, window_bounds = array<i64: 8, 128>}, {transform_indices = @transform_4, window_bounds = array<i64: 64, 128>}]} {
    %c0_i32 = arith.constant 0 : i32
    %0 = arith.cmpi eq, %arg2, %c0_i32 : i32
    %1 = arith.extui %0 : i1 to i32
    %c0_i32_0 = arith.constant 0 : i32
    %2 = arith.cmpi ne, %1, %c0_i32_0 : i32
    scf.if %2 {
      %cst_10 = arith.constant 0.000000e+00 : f32
      %12 = vector.broadcast %cst_10 : f32 to vector<64x128xf32>
      %c0_11 = arith.constant 0 : index
      %c0_12 = arith.constant 0 : index
      %13 = vector.load %arg8[%c0_11, %c0_12] : memref<64x128xf32, #tpu.memory_space<vmem>>, vector<64x128xf32>
      tpu.vector_store %arg8[%c0_11, %c0_12], %12 {strides = array<i32>} : memref<64x128xf32, #tpu.memory_space<vmem>>, vector<64x128xf32>,
    } else {
    }
    %c0 = arith.constant 0 : index
    %c0_1 = arith.constant 0 : index
    %3 = vector.load %arg8[%c0, %c0_1] : memref<64x128xf32, #tpu.memory_space<vmem>>, vector<64x128xf32>
    %c0_2 = arith.constant 0 : index
    %c0_3 = arith.constant 0 : index
    %4 = vector.load %arg3[%c0_2, %c0_3] : memref<64x128xbf16, #tpu.memory_space<vmem>>, vector<64x128xbf16>
    %c0_4 = arith.constant 0 : index
    %c0_5 = arith.constant 0 : index
    %5 = vector.load %arg4[%c0_4, %c0_5] : memref<128x128xbf16, #tpu.memory_space<vmem>>, vector<128x128xbf16>
    %cst = arith.constant dense<0.000000e+00> : vector<64x128xf32>
    %6 = tpu.matmul %4, %5, %cst {dimension_numbers = #tpu.dot_dimension_numbers<[1], [0], [0], [1], [0, 0, 1, 1], [], []>} : vector<64x128xbf16>, vector<128x128xbf16>, vector<64x128xf32> -> vector<64x128xf32>
    %7 = arith.addf %3, %6 : vector<64x128xf32>
    %c0_6 = arith.constant 0 : index
    %c0_7 = arith.constant 0 : index
    %8 = vector.load %arg8[%c0_6, %c0_7] : memref<64x128xf32, #tpu.memory_space<vmem>>, vector<64x128xf32>
    tpu.vector_store %arg8[%c0_6, %c0_7], %7 {strides = array<i32>} : memref<64x128xf32, #tpu.memory_space<vmem>>, vector<64x128xf32>,
    %c0_i32_8 = arith.constant 0 : i32
    %9 = arith.cmpi eq, %arg2, %c0_i32_8 : i32
    %10 = arith.extui %9 : i1 to i32
    %c0_i32_9 = arith.constant 0 : i32
    %11 = arith.cmpi ne, %10, %c0_i32_9 : i32
    scf.if %11 {
      %c0_10 = arith.constant 0 : index
      %c0_11 = arith.constant 0 : index
      %12 = vector.load %arg5[%c0_10, %c0_11] : memref<8x128xf32, #tpu.memory_space<vmem>>, vector<8x128xf32>
      %13 = vector.extract_strided_slice %12 {offsets = [0, 0], sizes = [1, 128], strides = [1, 1]} : vector<8x128xf32> to vector<1x128xf32>
      %c0_12 = arith.constant 0 : index
      %c0_13 = arith.constant 0 : index
      %14 = vector.load %arg6[%c0_12, %c0_13] : memref<8x128xf32, #tpu.memory_space<vmem>>, vector<8x128xf32>
      %15 = vector.extract_strided_slice %14 {offsets = [0, 0], sizes = [1, 128], strides = [1, 1]} : vector<8x128xf32> to vector<1x128xf32>
      %c0_14 = arith.constant 0 : index
      %c0_15 = arith.constant 0 : index
      %16 = vector.load %arg8[%c0_14, %c0_15] : memref<64x128xf32, #tpu.memory_space<vmem>>, vector<64x128xf32>
      %17 = vector.broadcast %13 : vector<1x128xf32> to vector<64x128xf32>
      %18 = arith.mulf %16, %17 : vector<64x128xf32>
      %19 = vector.broadcast %15 : vector<1x128xf32> to vector<64x128xf32>
      %20 = arith.addf %18, %19 : vector<64x128xf32>
      %c0_16 = arith.constant 0 : index
      %c0_17 = arith.constant 0 : index
      %21 = vector.load %arg7[%c0_16, %c0_17] : memref<64x128xf32, #tpu.memory_space<vmem>>, vector<64x128xf32>
      tpu.vector_store %arg7[%c0_16, %c0_17], %20 {strides = array<i32>} : memref<64x128xf32, #tpu.memory_space<vmem>>, vector<64x128xf32>,
    } else {
    }
    return
  }
  func.func @transform_0(%arg0: i32, %arg1: i32, %arg2: i32) -> (i32, i32) {
    %c0_i32 = arith.constant 0 : i32
    return %arg0, %arg2 : i32, i32
  }
  func.func @transform_1(%arg0: i32, %arg1: i32, %arg2: i32) -> (i32, i32) {
    %c0_i32 = arith.constant 0 : i32
    return %arg2, %arg1 : i32, i32
  }
  func.func @transform_2(%arg0: i32, %arg1: i32, %arg2: i32) -> (i32, i32) {
    %c0_i32 = arith.constant 0 : i32
    %c0_i32_0 = arith.constant 0 : i32
    return %c0_i32, %arg1 : i32, i32
  }
  func.func @transform_3(%arg0: i32, %arg1: i32, %arg2: i32) -> (i32, i32) {
    %c0_i32 = arith.constant 0 : i32
    %c0_i32_0 = arith.constant 0 : i32
    return %c0_i32, %arg1 : i32, i32
  }
  func.func @transform_4(%arg0: i32, %arg1: i32, %arg2: i32) -> (i32, i32) {
    %c0_i32 = arith.constant 0 : i32
    return %arg0, %arg1 : i32, i32
  }
}

</mosaic_0001>

<bundles_post_ra>
// kernel: tpu_custom_call.1
= control target key start
LH: loop header
LB: loop body
LE: loop exit
PB: predicated region body
PF: predicated region fallthrough
CT: control target
= control target key end

     0   :  { %9 = vsyncpa [#allocation4], 0  ;;  %s568_s0 = inlined_call_operand.hbm [shape: bf16[64,128], index: 0, kind: input, shape index: {}]   ;;  %s569_s1 = inlined_call_operand.hbm [shape: bf16[128,128], index: 1, kind: input, shape index: {}]   ;;  %s570_s2 = inlined_call_operand.hbm [shape: f32[8,128], index: 2, kind: input, shape index: {}]   ;;  %s571_s3 = inlined_call_operand.hbm [shape: f32[8,128], index: 3, kind: input, shape index: {}]   ;;  %s572_s4 = inlined_call_operand.hbm [shape: f32[64,128], index: 4, kind: output, shape index: {}]  }
   0x1   :  { %10 = vsyncpa [#allocation7], 0 }
   0x2   :  { %11 = vsyncpa [#allocation10], 0 }
   0x3   :  { %12 = vsyncpa [#allocation5], 0  ;;  %s30_s17 = sshll.u32 %s569_s1, 4  ;;  %s519_s18 = smov [#allocation6]   ;;  %s31_s17 = int_to_ptr.hbm [resolvable:$true] %s30_s17 }
   0x4   :  { %s32_s19 = sshll.u32 %s519_s18, 4  ;;  %s17_s22 = sshll.u32 %s568_s0, 4  ;;  %s33_s19 = int_to_ptr.vmem [resolvable:$true] %s32_s19  ;;  %s18_s22 = int_to_ptr.hbm [resolvable:$true] %s17_s22 }
   0x5   :  { %s520_s23 = smov 64   ;;  %s521_s24 = smov 4  }
   0x6   :  { %38 = dma.hbm_to_vmem [thread:$0]  %s31_s17, 1024, %s33_s19, [#allocation7], %s520_s23, %s520_s23, %s521_s24  }
   0x7   :  { %s522_s25 = smov [#allocation3]   ;;  %s44_s29 = sshll.u32 %s570_s2, 4  ;;  %s45_s29 = int_to_ptr.hbm [resolvable:$true] %s44_s29 }
   0x8   :  { %s19_s26 = sshll.u32 %s522_s25, 4  ;;  %s55_s5 = sshll.u32 %s571_s3, 4  ;;  %s20_s26 = int_to_ptr.vmem [resolvable:$true] %s19_s26  ;;  %s56_s5 = int_to_ptr.hbm [resolvable:$true] %s55_s5 }
   0x9   :  { %25 = dma.hbm_to_vmem [thread:$0]  %s18_s22, 512, %s20_s26, [#allocation4], %s520_s23, %s520_s23, %s521_s24  }
   0xa   :  { %s523_s6 = smov [#allocation8]   ;;  %s524_s0 = smov [#allocation9]  }
   0xb   :  { %s46_s7 = sshll.u32 %s523_s6, 4  ;;  %s57_s8 = sshll.u32 %s524_s0, 4  ;;  %s47_s7 = int_to_ptr.vmem [resolvable:$true] %s46_s7  ;;  %s58_s8 = int_to_ptr.vmem [resolvable:$true] %s57_s8 }
   0xc   :  { %49 = dma.hbm_to_vmem [thread:$0]  %s45_s29, 128, %s47_s7, [#allocation7]  }
   0xd   :  { %60 = dma.hbm_to_vmem [thread:$0]  %s56_s5, 128, %s58_s8, [#allocation10]  }
   0xe   :  { %511 = dma.done.wait [#allocation4], 512  }
   0xf   :  { %512 = vsyncadd [#allocation4], 4294966784 }
  0x10   :  { %513 = dma.done.wait [#allocation7], 1152  }
  0x11   :  { %514 = vsyncadd [#allocation7], 4294966144 }
  0x12   :  { %515 = dma.done.wait [#allocation10], 128  }
  0x13   :  { %516 = vsyncadd [#allocation10], 4294967168  ;;  %v357_v0 = vld [vmem:[#allocation6 + $0x38] sm:$0xff]  ;;  %v356_v1 = vld [vmem:[#allocation6 + $0x30] sm:$0xff]  ;;  %s525_s2 = smov [#allocation11]   ;;  %s283_s11 = sshll.u32 %s572_s4, 4  ;;  %s284_s11 = int_to_ptr.hbm [resolvable:$true] %s283_s11 }
  0x14   :  { %193 = vmatpush.bf16.msra.mxu0 %v357_v0  ;;  %358 = vmatpush.bf16.msra.mxu1 %v357_v0  ;;  %v355_v2 = vld [vmem:[#allocation6 + $0x28] sm:$0xff]  ;;  %v354_v3 = vld [vmem:[#allocation6 + $0x20] sm:$0xff]  ;;  %v353_v4 = vld [vmem:[#allocation6 + $0x18] sm:$0xff]  ;;  %s281_s3 = sshll.u32 %s525_s2, 4  ;;  %s526_s12 = smov 128   ;;  %s282_s3 = int_to_ptr.vmem [resolvable:$true] %s281_s3 }
  0x15   :  { %359 = vmatpush.bf16.msra.mxu2 %v357_v0  ;;  %360 = vmatpush.bf16.msra.mxu3 %v357_v0  ;;  %v352_v5 = vld [vmem:[#allocation6 + $0x10] sm:$0xff]  ;;  %v351_v6 = vld [vmem:[#allocation6 + $0x8] sm:$0xff]  ;;  %v350_v7 = vld [vmem:[#allocation6] sm:$0xff]  ;;  %s527_s13 = smov 8  }
  0x16   :  { %v346_v8 = vld [vmem:[#allocation3] sm:$0xff]  ;;  %v347_v9 = vld [vmem:[#allocation3 + $0x8] sm:$0xff]  ;;  %v348_v10 = vld [vmem:[#allocation3 + $0x10] sm:$0xff] }
  0x17   :  { %v349_v11 = vld [vmem:[#allocation3 + $0x18] sm:$0xff]  ;;  %v241_v12 = vld [vmem:[#allocation8] sm:$0xff]  ;;  %v242_v13 = vld [vmem:[#allocation9] sm:$0xff] }
  0x18   :  { %194 = vmatpush.bf16.msra.mxu0 %v356_v1  ;;  %361 = vmatpush.bf16.msra.mxu1 %v356_v1  ;;  %v251_v14 = vperm.slane %v241_v12, 0  ;;  %v260_v15 = vperm.slane %v242_v13, 0 }
  0x19   :  { %362 = vmatpush.bf16.msra.mxu2 %v356_v1  ;;  %363 = vmatpush.bf16.msra.mxu3 %v356_v1 }
  0x1c   :  { %195 = vmatpush.bf16.msra.mxu0 %v355_v2  ;;  %364 = vmatpush.bf16.msra.mxu1 %v355_v2 }
  0x1d   :  { %365 = vmatpush.bf16.msra.mxu2 %v355_v2  ;;  %366 = vmatpush.bf16.msra.mxu3 %v355_v2 }
  0x20   :  { %196 = vmatpush.bf16.msra.mxu0 %v354_v3  ;;  %367 = vmatpush.bf16.msra.mxu1 %v354_v3 }
  0x21   :  { %368 = vmatpush.bf16.msra.mxu2 %v354_v3  ;;  %369 = vmatpush.bf16.msra.mxu3 %v354_v3 }
  0x24   :  { %197 = vmatpush.bf16.msra.mxu0 %v353_v4  ;;  %370 = vmatpush.bf16.msra.mxu1 %v353_v4 }
  0x25   :  { %371 = vmatpush.bf16.msra.mxu2 %v353_v4  ;;  %372 = vmatpush.bf16.msra.mxu3 %v353_v4 }
  0x28   :  { %198 = vmatpush.bf16.msra.mxu0 %v352_v5  ;;  %373 = vmatpush.bf16.msra.mxu1 %v352_v5 }
  0x29   :  { %374 = vmatpush.bf16.msra.mxu2 %v352_v5  ;;  %375 = vmatpush.bf16.msra.mxu3 %v352_v5 }
  0x2c   :  { %199 = vmatpush.bf16.msra.mxu0 %v351_v6  ;;  %376 = vmatpush.bf16.msra.mxu1 %v351_v6 }
  0x2d   :  { %377 = vmatpush.bf16.msra.mxu2 %v351_v6  ;;  %378 = vmatpush.bf16.msra.mxu3 %v351_v6 }
  0x30   :  { %200 = vmatpush.bf16.msra.mxu0 %v350_v7  ;;  %379 = vmatpush.bf16.msra.mxu1 %v350_v7 }
  0x31   :  { %380 = vmatpush.bf16.msra.mxu2 %v350_v7  ;;  %381 = vmatpush.bf16.msra.mxu3 %v350_v7 }
  0x33   :  { %201 = vmatmul.bf16.vlgmr.msra.gmra.mxu0 %v346_v8  ;;  %206 = vmatmul.bf16.vlgmr.msra.gmra.mxu1 %v347_v9 }
  0x34   :  { %211 = vmatmul.bf16.vlgmr.msra.gmra.mxu2 %v348_v10  ;;  %216 = vmatmul.bf16.vlgmr.msra.gmra.mxu3 %v349_v11 }
  0xb0   :  { %v202_v16 = vpop.f32.mrf.mxu0  ;;  %v207_v17 = vpop.f32.mrf.mxu1 }
  0xb1   :  { %v252_v18 = vmul.f32 %v251_v14, %v202_v16  ;;  %v254_v19 = vmul.f32 %v251_v14, %v207_v17 }
  0xb3   :  { %v261_v20 = vadd.f32 %v260_v15, %v252_v18  ;;  %v263_v21 = vadd.f32 %v260_v15, %v254_v19 }
  0xb5   :  { %269 = vst [vmem:[#allocation11] sm:$0xff] %v261_v20 }
  0xb6   :  { %271 = vst [vmem:[#allocation11 + $0x10] sm:$0xff] %v263_v21 }
  0xb7   :  { %v212_v22 = vpop.f32.mrf.mxu2  ;;  %v217_v23 = vpop.f32.mrf.mxu3 }
  0xb8   :  { %v256_v24 = vmul.f32 %v251_v14, %v212_v22  ;;  %v258_v25 = vmul.f32 %v251_v14, %v217_v23  ;;  %v204_v26 = vpop.f32.mrf.mxu0  ;;  %v209_v27 = vpop.f32.mrf.mxu1 }
  0xb9   :  { %v253_v28 = vmul.f32 %v251_v14, %v204_v26  ;;  %v255_v29 = vmul.f32 %v251_v14, %v209_v27 }
  0xba   :  { %v265_v30 = vadd.f32 %v260_v15, %v256_v24  ;;  %v267_v31 = vadd.f32 %v260_v15, %v258_v25 }
  0xbb   :  { %v262_v32 = vadd.f32 %v260_v15, %v253_v28  ;;  %v264_v33 = vadd.f32 %v260_v15, %v255_v29 }
  0xbc   :  { %273 = vst [vmem:[#allocation11 + $0x20] sm:$0xff] %v265_v30 }
  0xbd   :  { %275 = vst [vmem:[#allocation11 + $0x30] sm:$0xff] %v267_v31 }
  0xbe   :  { %270 = vst [vmem:[#allocation11 + $0x8] sm:$0xff] %v262_v32 }
  0xbf   :  { %272 = vst [vmem:[#allocation11 + $0x18] sm:$0xff] %v264_v33  ;;  %v214_v34 = vpop.f32.mrf.mxu2  ;;  %v219_v35 = vpop.f32.mrf.mxu3 }
  0xc0   :  { %v257_v36 = vmul.f32 %v251_v14, %v214_v34  ;;  %v259_v37 = vmul.f32 %v251_v14, %v219_v35 }
  0xc2   :  { %v266_v38 = vadd.f32 %v260_v15, %v257_v36  ;;  %v268_v39 = vadd.f32 %v260_v15, %v259_v37 }
  0xc4   :  { %274 = vst [vmem:[#allocation11 + $0x28] sm:$0xff] %v266_v38 }
  0xc5   :  { %276 = vst [vmem:[#allocation11 + $0x38] sm:$0xff] %v268_v39 }
  0xc6   :  { %289 = dma.vmem_to_hbm [thread:$0]  %s282_s3, 1024, %s284_s11, [#allocation5], %s526_s12, %s526_s12, %s527_s13  }
  0xc7   :  { %517 = dma.done.wait [#allocation5], 1024  }
  0xc8   :  { %518 = vsyncadd [#allocation5], 4294966272 }
  0xc9   :  { %294 = vsyncpa [#allocation4], 1 }
  0xca   :  { %295 = vsyncpa [#allocation7], 1 }
  0xcb   :  { %296 = vsyncpa [#allocation10], 1 }
  0xcc   :  { %297 = vsyncpa [#allocation5], 1 }

</bundles_post_ra>
